<compile_context>
chip_gen: v5e
topology: v5e:2x2
jax: 0.10.0
libtpu: 0.0.40
codegen_flags: <defaults>
</compile_context>

<pallas_src>
import functools

import jax
import jax.numpy as jnp
from jax.experimental import pallas as pl
from jax.experimental.pallas import tpu as pltpu

MAX_TILE_N = 4096  # points per grid step (lane axis), multiple of 128


def _panoptic_point_kernel(ignore_index, sigma, n_points,
                           logits_ref, sem_ref, ins_ref,
                           poff_ref, goff_ref, phmap_ref,
                           bce_ref, acc_ref):
    # acc layout per batch: (5, 1) = [ce_sum, valid_cnt, offset_sum, fg_cnt, bce_sum]
    i = pl.program_id(1)

    @pl.when(i == 0)
    def _():
        acc_ref[...] = jnp.zeros_like(acc_ref)

    logits = logits_ref[0]                          # (C, TN) f32
    tgt = sem_ref[0]                                # (1, TN) i32
    ins = ins_ref[0]                                # (1, TN) i32
    poff = poff_ref[0]                              # (3, TN) f32
    goff = goff_ref[0]                              # (3, TN) f32
    ph = phmap_ref[0]                               # (1, TN) f32

    tn = logits.shape[1]
    # Tail mask: last tile may overhang N; mask in-kernel instead of padding HBM.
    col = jax.lax.broadcasted_iota(jnp.int32, (1, tn), 1) + i * tn
    inb = col < n_points

    valid_b = (tgt != ignore_index) & inb           # (1, TN) bool
    fg_b = (ins >= 0) & inb
    validf = jnp.where(valid_b, 1.0, 0.0)
    fgf = jnp.where(fg_b, 1.0, 0.0)

    # ---- cross-entropy: log-softmax over class (sublane) axis + target gather
    m = jnp.max(logits, axis=0, keepdims=True)
    lse = jnp.log(jnp.sum(jnp.exp(logits - m), axis=0, keepdims=True)) + m
    cls = jax.lax.broadcasted_iota(jnp.int32, logits.shape, 0)
    onehot = jnp.where(cls == tgt, 1.0, 0.0)
    logit_t = jnp.sum(logits * onehot, axis=0, keepdims=True)
    nll = jnp.where(valid_b, lse - logit_t, 0.0)    # (1, TN)

    # ---- offset regression: per-point L2 distance (fg points only)
    diff = poff - goff
    dist = jnp.sqrt(jnp.sum(diff * diff, axis=0, keepdims=True))
    off = jnp.where(fg_b, dist, 0.0)

    # ---- gaussian gt heat-map + BCE against pred_hmap
    gt_sq = jnp.sum(goff * goff, axis=0, keepdims=True)
    gt_hmap = jnp.where(fg_b, jnp.exp(-gt_sq / (2.0 * sigma * sigma)), 0.0)
    bce = -(gt_hmap * jnp.log(ph + 1e-12)
            + (1.0 - gt_hmap) * jnp.log(1.0 - ph + 1e-12))
    bce_ref[0] = jnp.where(valid_b, bce, jnp.float32(-1e30))  # sentinel for OHEM top-k
    bce_acc = jnp.where(valid_b, bce, 0.0)

    # ---- single combined reduction + one accumulator update per step
    stacked = jnp.concatenate([nll, validf, off, fgf, bce_acc], axis=0)  # (5, TN)
    acc_ref[0] += jnp.sum(stacked, axis=1, keepdims=True)                # (5, 1)


def _point_losses(logits3, sem3, ins3, poff3, goff3, phm3, ignore_index, sigma):
    """Run the Pallas kernel over all points.

    Inputs are lane-major: logits3 (B, C, N), others (B, {1,3}, N).
    Returns (bce_flat (B*N,), acc_vec (5,)).
    """
    B, C, N = logits3.shape
    tile_n = min(MAX_TILE_N, ((N + 127) // 128) * 128)
    grid = (B, pl.cdiv(N, tile_n))

    kernel = functools.partial(_panoptic_point_kernel,
                               int(ignore_index), float(sigma), int(N))
    bce, acc = pl.pallas_call(
        kernel,
        out_shape=(jax.ShapeDtypeStruct((B, 1, N), jnp.float32),
                   jax.ShapeDtypeStruct((B, 5, 1), jnp.float32)),
        grid_spec=pltpu.PrefetchScalarGridSpec(
            num_scalar_prefetch=0,
            grid=grid,
            in_specs=[
                pl.BlockSpec((1, C, tile_n), lambda b, i: (b, 0, i)),
                pl.BlockSpec((1, 1, tile_n), lambda b, i: (b, 0, i)),
                pl.BlockSpec((1, 1, tile_n), lambda b, i: (b, 0, i)),
                pl.BlockSpec((1, 3, tile_n), lambda b, i: (b, 0, i)),
                pl.BlockSpec((1, 3, tile_n), lambda b, i: (b, 0, i)),
                pl.BlockSpec((1, 1, tile_n), lambda b, i: (b, 0, i)),
            ],
            out_specs=[
                pl.BlockSpec((1, 1, tile_n), lambda b, i: (b, 0, i)),
                pl.BlockSpec((1, 5, 1), lambda b, i: (b, 0, 0)),
            ],
        ),
        compiler_params=pltpu.CompilerParams(
            dimension_semantics=("parallel", "arbitrary")),
    )(logits3, sem3, ins3, poff3, goff3, phm3)

    acc_vec = jnp.sum(acc[:, :, 0], axis=0)   # per-batch partials -> (5,)
    return bce.reshape(B * N), acc_vec


def _lovasz_softmax(logits3, labels_flat, ignore_index):
    # TODO(synk): lovasz-softmax needs a global data-dependent argsort; no clean
    # Pallas TPU lowering, kept in plain JAX (vectorized over classes).
    B, C, N = logits3.shape
    P = B * N
    pc = jnp.transpose(logits3, (1, 0, 2)).reshape(C, P)        # (C, P), b-major points
    valid = labels_flat != ignore_index                          # (P,)
    validf = valid.astype(jnp.float32)
    fg = jnp.where(
        (labels_flat[None, :] == jnp.arange(C, dtype=jnp.int32)[:, None])
        & valid[None, :], 1.0, 0.0)                              # (C, P)
    errors = jnp.abs(fg - pc)
    key = jnp.where(valid[None, :], errors, -jnp.inf)            # ignored sort last
    order = jnp.argsort(-key, axis=1)                            # descending per class
    errors_s = jnp.take_along_axis(errors * validf[None, :], order, axis=1)
    fg_s = jnp.take_along_axis(fg, order, axis=1)
    valid_s = validf[order]                                      # (C, P)
    gts = jnp.sum(fg_s, axis=1, keepdims=True)                   # (C, 1)
    intersection = gts - jnp.cumsum(fg_s, axis=1)
    union = gts + jnp.cumsum((1.0 - fg_s) * valid_s, axis=1)
    jaccard = 1.0 - intersection / jnp.maximum(union, 1e-12)
    grad = jnp.concatenate([jaccard[:, :1], jaccard[:, 1:] - jaccard[:, :-1]], axis=1)
    losses = jnp.sum(errors_s * grad, axis=1)                    # (C,)
    present = jnp.where(gts[:, 0] > 0, 1.0, 0.0)
    return jnp.sum(losses * present) / jnp.maximum(jnp.sum(present), 1.0)


def _panoptic_forward(pred_sem, pred_offset, pred_hmap, gt_offset,
                      gt_ins_label, gt_sem, *,
                      ce_weight, lovasz_weight, center_weight, offset_weight,
                      sigma, ignore_index, top_ratio, top_weight):
    B, C, N, _ = pred_sem.shape

    # Lane-major views: no transpose of the big logits tensor needed.
    logits3 = pred_sem[..., 0].astype(jnp.float32)                     # (B, C, N)
    sem3 = gt_sem.reshape(B, 1, N).astype(jnp.int32)                   # (B, 1, N)
    ins3 = gt_ins_label.reshape(B, 1, N).astype(jnp.int32)             # (B, 1, N)
    poff3 = jnp.transpose(pred_offset, (0, 2, 1)).astype(jnp.float32)  # (B, 3, N)
    goff3 = jnp.transpose(gt_offset, (0, 2, 1)).astype(jnp.float32)    # (B, 3, N)
    phm3 = pred_hmap.reshape(B, 1, N).astype(jnp.float32)              # (B, 1, N)

    bce_flat, acc = _point_losses(logits3, sem3, ins3, poff3, goff3, phm3,
                                  ignore_index, sigma)
    ce_sum, valid_sum, off_sum, fg_sum, bce_sum = (
        acc[0], acc[1], acc[2], acc[3], acc[4])
    valid_cnt = jnp.round(valid_sum)   # exact integer counts (fp-robust)
    fg_cnt = jnp.round(fg_sum)

    # nn.CrossEntropyLoss(ignore_index) with 'mean' reduction
    loss_ce = ce_sum / valid_cnt

    # loss_offset = (dist * fg).sum() / (int(fg.sum()) + 1e-12)
    loss_offset = off_sum / (fg_cnt + 1e-12)

    # BCE_OHEM over valid points (torch boolean masking -> flat valid vector).
    loss_base = bce_sum / (valid_cnt + 1e-12)
    P = B * N
    static_k = min(P, int(P * top_ratio) + 1)   # static upper bound on top-k size
    if top_ratio > 0.0 and static_k > 0:
        topk_num = jnp.floor(valid_cnt * top_ratio)          # dynamic k
        top_vals = jax.lax.top_k(bce_flat, static_k)[0]      # descending; -1e30 sentinels last
        idx = jnp.arange(static_k, dtype=jnp.float32)
        topk_sum = jnp.sum(jnp.where(idx < topk_num, top_vals, 0.0))
        topk_mean = topk_sum / jnp.maximum(topk_num, 1.0)
        loss_center = jnp.where(topk_num > 0,
                                loss_base + top_weight * topk_mean, loss_base)
    else:
        loss_center = loss_base

    loss_lovasz = _lovasz_softmax(logits3, sem3.reshape(-1), ignore_index)

    return (ce_weight * loss_ce
            + lovasz_weight * loss_lovasz
            + center_weight * loss_center
            + offset_weight * loss_offset)


class PanopticLossV1:
    def __init__(self, ce_weight, lovasz_weight, center_weight, offset_weight,
                 sigma, ignore_index, loss_seg_dic, loss_ins_dic):
        # TODO(synk): only loss_seg_dic['type'] == 'ce' implemented
        # (the 'wce'/'ohem' branches only change the seg criterion).
        assert loss_seg_dic['type'] == 'ce'
        self._fn = jax.jit(functools.partial(
            _panoptic_forward,
            ce_weight=float(ce_weight),
            lovasz_weight=float(lovasz_weight),
            center_weight=float(center_weight),
            offset_weight=float(offset_weight),
            sigma=float(sigma),
            ignore_index=int(ignore_index),
            top_ratio=float(loss_ins_dic['top_ratio']),
            top_weight=float(loss_ins_dic['top_weight'])))

    def __call__(self, pred_sem, pred_offset, pred_hmap, gt_offset,
                 gt_ins_label, gt_sem):
        return self._fn(pred_sem, pred_offset, pred_hmap, gt_offset,
                        gt_ins_label, gt_sem)


if __name__ == "__main__":
    key = jax.random.PRNGKey(0)
    B, C, N = 2, 8, 256
    ks = jax.random.split(key, 6)
    pred_sem = jax.random.normal(ks[0], (B, C, N, 1), dtype=jnp.float32)
    pred_offset = jax.random.normal(ks[1], (B, N, 3), dtype=jnp.float32)
    gt_offset = jax.random.normal(ks[2], (B, N, 3), dtype=jnp.float32)
    pred_hmap = jax.nn.sigmoid(jax.random.normal(ks[3], (B, N, 1), dtype=jnp.float32))
    gt_ins_label = jax.random.randint(ks[4], (B, N, 1), -1, 5, dtype=jnp.int32)
    gt_sem = jax.random.randint(ks[5], (B, N, 1), 0, C, dtype=jnp.int32)

    loss_fn = PanopticLossV1(
        ce_weight=1.0, lovasz_weight=1.0, center_weight=1.0, offset_weight=1.0,
        sigma=1.0, ignore_index=0,
        loss_seg_dic={'type': 'ce'},
        loss_ins_dic={'top_ratio': 0.3, 'top_weight': 1.0})

    loss = loss_fn(pred_sem, pred_offset, pred_hmap, gt_offset,
                   gt_ins_label, gt_sem)
    jax.block_until_ready(loss)
    print("KERNEL_OK")
</pallas_src>

<mosaic_0001>
module attributes {stable_mosaic.version = 11 : i64} {
  func.func @_panoptic_point_kernel(%arg0: i32, %arg1: i32, %arg2: memref<1x8x256xf32, #tpu.memory_space<vmem>>, %arg3: memref<1x1x256xi32, #tpu.memory_space<vmem>>, %arg4: memref<1x1x256xi32, #tpu.memory_space<vmem>>, %arg5: memref<1x3x256xf32, #tpu.memory_space<vmem>>, %arg6: memref<1x3x256xf32, #tpu.memory_space<vmem>>, %arg7: memref<1x1x256xf32, #tpu.memory_space<vmem>>, %arg8: memref<1x1x256xf32, #tpu.memory_space<vmem>>, %arg9: memref<1x5x1xf32, #tpu.memory_space<vmem>>) attributes {dimension_semantics = [#tpu.dimension_semantics<parallel>, #tpu.dimension_semantics<arbitrary>], iteration_bounds = array<i64: 2, 1>, scalar_prefetch = 0 : i64, scratch_operands = 0 : i64, tpu.core_type = #tpu.core_type<tc>, window_params = [{transform_indices = @transform_0, window_bounds = array<i64: 1, 8, 256>}, {transform_indices = @transform_1, window_bounds = array<i64: 1, 1, 256>}, {transform_indices = @transform_2, window_bounds = array<i64: 1, 1, 256>}, {transform_indices = @transform_3, window_bounds = array<i64: 1, 3, 256>}, {transform_indices = @transform_4, window_bounds = array<i64: 1, 3, 256>}, {transform_indices = @transform_5, window_bounds = array<i64: 1, 1, 256>}, {transform_indices = @transform_6, window_bounds = array<i64: 1, 1, 256>}, {transform_indices = @transform_7, window_bounds = array<i64: 1, 5, 1>}]} {
    %c0_i32 = arith.constant 0 : i32
    %0 = arith.cmpi eq, %arg1, %c0_i32 : i32
    %1 = arith.extui %0 : i1 to i32
    %c0_i32_0 = arith.constant 0 : i32
    %2 = arith.cmpi ne, %1, %c0_i32_0 : i32
    scf.if %2 {
      %cst_53 = arith.constant 0.000000e+00 : f32
      %102 = vector.broadcast %cst_53 : f32 to vector<1x5x1xf32>
      %c0_54 = arith.constant 0 : index
      %c0_55 = arith.constant 0 : index
      %c0_56 = arith.constant 0 : index
      %103 = vector.load %arg9[%c0_54, %c0_55, %c0_56] : memref<1x5x1xf32, #tpu.memory_space<vmem>>, vector<1x5x1xf32>
      tpu.vector_store %arg9[%c0_54, %c0_55, %c0_56], %102 {strides = array<i32>} : memref<1x5x1xf32, #tpu.memory_space<vmem>>, vector<1x5x1xf32>,
    } else {
    }
    %c0 = arith.constant 0 : index
    %c0_1 = arith.constant 0 : index
    %c0_2 = arith.constant 0 : index
    %3 = vector.load %arg2[%c0, %c0_1, %c0_2] : memref<1x8x256xf32, #tpu.memory_space<vmem>>, vector<1x8x256xf32>
    %4 = vector.shape_cast %3 : vector<1x8x256xf32> to vector<8x256xf32>
    %c0_3 = arith.constant 0 : index
    %c0_4 = arith.constant 0 : index
    %c0_5 = arith.constant 0 : index
    %5 = vector.load %arg3[%c0_3, %c0_4, %c0_5] : memref<1x1x256xi32, #tpu.memory_space<vmem>>, vector<1x1x256xi32>
    %6 = vector.shape_cast %5 : vector<1x1x256xi32> to vector<1x256xi32>
    %c0_6 = arith.constant 0 : index
    %c0_7 = arith.constant 0 : index
    %c0_8 = arith.constant 0 : index
    %7 = vector.load %arg4[%c0_6, %c0_7, %c0_8] : memref<1x1x256xi32, #tpu.memory_space<vmem>>, vector<1x1x256xi32>
    %8 = vector.shape_cast %7 : vector<1x1x256xi32> to vector<1x256xi32>
    %c0_9 = arith.constant 0 : index
    %c0_10 = arith.constant 0 : index
    %c0_11 = arith.constant 0 : index
    %9 = vector.load %arg5[%c0_9, %c0_10, %c0_11] : memref<1x3x256xf32, #tpu.memory_space<vmem>>, vector<1x3x256xf32>
    %10 = vector.shape_cast %9 : vector<1x3x256xf32> to vector<3x256xf32>
    %c0_12 = arith.constant 0 : index
    %c0_13 = arith.constant 0 : index
    %c0_14 = arith.constant 0 : index
    %11 = vector.load %arg6[%c0_12, %c0_13, %c0_14] : memref<1x3x256xf32, #tpu.memory_space<vmem>>, vector<1x3x256xf32>
    %12 = vector.shape_cast %11 : vector<1x3x256xf32> to vector<3x256xf32>
    %c0_15 = arith.constant 0 : index
    %c0_16 = arith.constant 0 : index
    %c0_17 = arith.constant 0 : index
    %13 = vector.load %arg7[%c0_15, %c0_16, %c0_17] : memref<1x1x256xf32, #tpu.memory_space<vmem>>, vector<1x1x256xf32>
    %14 = vector.shape_cast %13 : vector<1x1x256xf32> to vector<1x256xf32>
    %15 = tpu.iota {dimensions = array<i32: 1>} : vector<1x256xi32>
    %c256_i32 = arith.constant 256 : i32
    %16 = arith.muli %arg1, %c256_i32 : i32
    %17 = vector.broadcast %16 : i32 to vector<1x256xi32>
    %18 = arith.addi %15, %17 : vector<1x256xi32>
    %c256_i32_18 = arith.constant 256 : i32
    %19 = vector.broadcast %c256_i32_18 : i32 to vector<1x256xi32>
    %20 = arith.cmpi slt, %18, %19 : vector<1x256xi32>
    %c0_i32_19 = arith.constant 0 : i32
    %21 = vector.broadcast %c0_i32_19 : i32 to vector<1x256xi32>
    %22 = arith.cmpi ne, %6, %21 : vector<1x256xi32>
    %23 = arith.andi %22, %20 : vector<1x256xi1>
    %c0_i32_20 = arith.constant 0 : i32
    %24 = vector.broadcast %c0_i32_20 : i32 to vector<1x256xi32>
    %25 = arith.cmpi sge, %8, %24 : vector<1x256xi32>
    %26 = arith.andi %25, %20 : vector<1x256xi1>
    %cst = arith.constant 1.000000e+00 : f32
    %cst_21 = arith.constant 0.000000e+00 : f32
    %27 = vector.broadcast %cst : f32 to vector<1x256xf32>
    %28 = vector.broadcast %cst_21 : f32 to vector<1x256xf32>
    %29 = arith.select %23, %27, %28 : vector<1x256xi1>, vector<1x256xf32>
    %cst_22 = arith.constant 1.000000e+00 : f32
    %cst_23 = arith.constant 0.000000e+00 : f32
    %30 = vector.broadcast %cst_22 : f32 to vector<1x256xf32>
    %31 = vector.broadcast %cst_23 : f32 to vector<1x256xf32>
    %32 = arith.select %26, %30, %31 : vector<1x256xi1>, vector<1x256xf32>
    %cst_24 = arith.constant dense<0xFF800000> : vector<256xf32>
    %33 = vector.multi_reduction <maximumf>, %4, %cst_24 [0] : vector<8x256xf32> to vector<256xf32>
    %34 = vector.shape_cast %33 : vector<256xf32> to vector<1x256xf32>
    %35 = vector.broadcast %34 : vector<1x256xf32> to vector<8x256xf32>
    %36 = arith.subf %4, %35 : vector<8x256xf32>
    %37 = math.exp %36 : vector<8x256xf32>
    %cst_25 = arith.constant dense<0.000000e+00> : vector<256xf32>
    %38 = vector.multi_reduction <add>, %37, %cst_25 [0] : vector<8x256xf32> to vector<256xf32>
    %39 = vector.shape_cast %38 : vector<256xf32> to vector<1x256xf32>
    %40 = math.log %39 : vector<1x256xf32>
    %41 = arith.addf %40, %34 : vector<1x256xf32>
    %42 = tpu.iota {dimensions = array<i32: 0>} : vector<8x256xi32>
    %43 = vector.broadcast %6 : vector<1x256xi32> to vector<8x256xi32>
    %44 = arith.cmpi eq, %42, %43 : vector<8x256xi32>
    %cst_26 = arith.constant 1.000000e+00 : f32
    %cst_27 = arith.constant 0.000000e+00 : f32
    %45 = vector.broadcast %cst_26 : f32 to vector<8x256xf32>
    %46 = vector.broadcast %cst_27 : f32 to vector<8x256xf32>
    %47 = arith.select %44, %45, %46 : vector<8x256xi1>, vector<8x256xf32>
    %48 = arith.mulf %4, %47 : vector<8x256xf32>
    %cst_28 = arith.constant dense<0.000000e+00> : vector<256xf32>
    %49 = vector.multi_reduction <add>, %48, %cst_28 [0] : vector<8x256xf32> to vector<256xf32>
    %50 = vector.shape_cast %49 : vector<256xf32> to vector<1x256xf32>
    %51 = arith.subf %41, %50 : vector<1x256xf32>
    %cst_29 = arith.constant 0.000000e+00 : f32
    %52 = vector.broadcast %cst_29 : f32 to vector<1x256xf32>
    %53 = arith.select %23, %51, %52 : vector<1x256xi1>, vector<1x256xf32>
    %54 = arith.subf %10, %12 : vector<3x256xf32>
    %55 = arith.mulf %54, %54 : vector<3x256xf32>
    %cst_30 = arith.constant dense<0.000000e+00> : vector<256xf32>
    %56 = vector.multi_reduction <add>, %55, %cst_30 [0] : vector<3x256xf32> to vector<256xf32>
    %57 = vector.shape_cast %56 : vector<256xf32> to vector<1x256xf32>
    %58 = math.sqrt %57 : vector<1x256xf32>
    %cst_31 = arith.constant 0.000000e+00 : f32
    %59 = vector.broadcast %cst_31 : f32 to vector<1x256xf32>
    %60 = arith.select %26, %58, %59 : vector<1x256xi1>, vector<1x256xf32>
    %61 = arith.mulf %12, %12 : vector<3x256xf32>
    %cst_32 = arith.constant dense<0.000000e+00> : vector<256xf32>
    %62 = vector.multi_reduction <add>, %61, %cst_32 [0] : vector<3x256xf32> to vector<256xf32>
    %63 = vector.shape_cast %62 : vector<256xf32> to vector<1x256xf32>
    %cst_33 = arith.constant 0.000000e+00 : f32
    %64 = vector.broadcast %cst_33 : f32 to vector<1x256xf32>
    %65 = arith.subf %64, %63 : vector<1x256xf32>
    %cst_34 = arith.constant 2.000000e+00 : f32
    %66 = vector.broadcast %cst_34 : f32 to vector<1x256xf32>
    %67 = arith.divf %65, %66 : vector<1x256xf32>
    %68 = math.exp %67 : vector<1x256xf32>
    %cst_35 = arith.constant 0.000000e+00 : f32
    %69 = vector.broadcast %cst_35 : f32 to vector<1x256xf32>
    %70 = arith.select %26, %68, %69 : vector<1x256xi1>, vector<1x256xf32>
    %cst_36 = arith.constant 9.99999996E-13 : f32
    %71 = vector.broadcast %cst_36 : f32 to vector<1x256xf32>
    %72 = arith.addf %14, %71 : vector<1x256xf32>
    %73 = math.log %72 : vector<1x256xf32>
    %74 = arith.mulf %70, %73 : vector<1x256xf32>
    %cst_37 = arith.constant 1.000000e+00 : f32
    %75 = vector.broadcast %cst_37 : f32 to vector<1x256xf32>
    %76 = arith.subf %75, %70 : vector<1x256xf32>
    %cst_38 = arith.constant 1.000000e+00 : f32
    %77 = vector.broadcast %cst_38 : f32 to vector<1x256xf32>
    %78 = arith.subf %77, %14 : vector<1x256xf32>
    %cst_39 = arith.constant 9.99999996E-13 : f32
    %79 = vector.broadcast %cst_39 : f32 to vector<1x256xf32>
    %80 = arith.addf %78, %79 : vector<1x256xf32>
    %81 = math.log %80 : vector<1x256xf32>
    %82 = arith.mulf %76, %81 : vector<1x256xf32>
    %83 = arith.addf %74, %82 : vector<1x256xf32>
    %cst_40 = arith.constant 0.000000e+00 : f32
    %84 = vector.broadcast %cst_40 : f32 to vector<1x256xf32>
    %85 = arith.subf %84, %83 : vector<1x256xf32>
    %cst_41 = arith.constant -1.000000e+30 : f32
    %86 = vector.broadcast %cst_41 : f32 to vector<1x256xf32>
    %87 = arith.select %23, %85, %86 : vector<1x256xi1>, vector<1x256xf32>
    %c0_42 = arith.constant 0 : index
    %c0_43 = arith.constant 0 : index
    %c0_44 = arith.constant 0 : index
    %88 = vector.load %arg8[%c0_42, %c0_43, %c0_44] : memref<1x1x256xf32, #tpu.memory_space<vmem>>, vector<1x1x256xf32>
    %89 = vector.shape_cast %88 : vector<1x1x256xf32> to vector<1x256xf32>
    %90 = vector.shape_cast %87 : vector<1x256xf32> to vector<1x1x256xf32>
    tpu.vector_store %arg8[%c0_42, %c0_43, %c0_44], %90 {strides = array<i32>} : memref<1x1x256xf32, #tpu.memory_space<vmem>>, vector<1x1x256xf32>,
    %cst_45 = arith.constant 0.000000e+00 : f32
    %91 = vector.broadcast %cst_45 : f32 to vector<1x256xf32>
    %92 = arith.select %23, %85, %91 : vector<1x256xi1>, vector<1x256xf32>
    %93 = tpu.concatenate %53, %29, %60, %32, %92 in 0 : vector<1x256xf32>, vector<1x256xf32>, vector<1x256xf32>, vector<1x256xf32>, vector<1x256xf32> -> vector<5x256xf32>
    %c0_46 = arith.constant 0 : index
    %c0_47 = arith.constant 0 : index
    %c0_48 = arith.constant 0 : index
    %94 = vector.load %arg9[%c0_46, %c0_47, %c0_48] : memref<1x5x1xf32, #tpu.memory_space<vmem>>, vector<1x5x1xf32>
    %95 = vector.shape_cast %94 : vector<1x5x1xf32> to vector<5x1xf32>
    %cst_49 = arith.constant dense<0.000000e+00> : vector<5xf32>
    %96 = vector.multi_reduction <add>, %93, %cst_49 [1] : vector<5x256xf32> to vector<5xf32>
    %97 = vector.shape_cast %96 : vector<5xf32> to vector<5x1xf32>
    %98 = arith.addf %95, %97 : vector<5x1xf32>
    %c0_50 = arith.constant 0 : index
    %c0_51 = arith.constant 0 : index
    %c0_52 = arith.constant 0 : index
    %99 = vector.load %arg9[%c0_50, %c0_51, %c0_52] : memref<1x5x1xf32, #tpu.memory_space<vmem>>, vector<1x5x1xf32>
    %100 = vector.shape_cast %99 : vector<1x5x1xf32> to vector<5x1xf32>
    %101 = vector.shape_cast %98 : vector<5x1xf32> to vector<1x5x1xf32>
    tpu.vector_store %arg9[%c0_50, %c0_51, %c0_52], %101 {strides = array<i32>} : memref<1x5x1xf32, #tpu.memory_space<vmem>>, vector<1x5x1xf32>,
    return
  }
  func.func @transform_0(%arg0: i32, %arg1: i32) -> (i32, i32, i32) {
    %c0_i32 = arith.constant 0 : i32
    %c0_i32_0 = arith.constant 0 : i32
    return %arg0, %c0_i32, %arg1 : i32, i32, i32
  }
  func.func @transform_1(%arg0: i32, %arg1: i32) -> (i32, i32, i32) {
    %c0_i32 = arith.constant 0 : i32
    %c0_i32_0 = arith.constant 0 : i32
    return %arg0, %c0_i32, %arg1 : i32, i32, i32
  }
  func.func @transform_2(%arg0: i32, %arg1: i32) -> (i32, i32, i32) {
    %c0_i32 = arith.constant 0 : i32
    %c0_i32_0 = arith.constant 0 : i32
    return %arg0, %c0_i32, %arg1 : i32, i32, i32
  }
  func.func @transform_3(%arg0: i32, %arg1: i32) -> (i32, i32, i32) {
    %c0_i32 = arith.constant 0 : i32
    %c0_i32_0 = arith.constant 0 : i32
    return %arg0, %c0_i32, %arg1 : i32, i32, i32
  }
  func.func @transform_4(%arg0: i32, %arg1: i32) -> (i32, i32, i32) {
    %c0_i32 = arith.constant 0 : i32
    %c0_i32_0 = arith.constant 0 : i32
    return %arg0, %c0_i32, %arg1 : i32, i32, i32
  }
  func.func @transform_5(%arg0: i32, %arg1: i32) -> (i32, i32, i32) {
    %c0_i32 = arith.constant 0 : i32
    %c0_i32_0 = arith.constant 0 : i32
    return %arg0, %c0_i32, %arg1 : i32, i32, i32
  }
  func.func @transform_6(%arg0: i32, %arg1: i32) -> (i32, i32, i32) {
    %c0_i32 = arith.constant 0 : i32
    %c0_i32_0 = arith.constant 0 : i32
    return %arg0, %c0_i32, %arg1 : i32, i32, i32
  }
  func.func @transform_7(%arg0: i32, %arg1: i32) -> (i32, i32, i32) {
    %c0_i32 = arith.constant 0 : i32
    %c0_i32_0 = arith.constant 0 : i32
    %c0_i32_1 = arith.constant 0 : i32
    return %arg0, %c0_i32, %c0_i32_0 : i32, i32, i32
  }
}

</mosaic_0001>

<bundles_post_ra>
// kernel: _panoptic_forward.1
= control target key start
LH: loop header
LB: loop body
LE: loop exit
PB: predicated region body
PF: predicated region fallthrough
CT: control target
= control target key end

     0   :  { %s1087_s24 = smov 0   ;;  %s1089_s25 = smov 0   ;;  %s1230_s0 = inlined_call_operand.vmem [shape: f32[2,8,256], index: 0, kind: input, shape index: {}]   ;;  %s1231_s1 = inlined_call_operand.vmem [shape: s32[2,1,256], index: 1, kind: input, shape index: {}]   ;;  %s1232_s2 = inlined_call_operand.vmem [shape: s32[2,1,256], index: 2, kind: input, shape index: {}]   ;;  %s1233_s3 = inlined_call_operand.vmem [shape: f32[2,3,256], index: 3, kind: input, shape index: {}]   ;;  %s1234_s4 = inlined_call_operand.vmem [shape: f32[2,3,256], index: 4, kind: input, shape index: {}]   ;;  %s1235_s5 = inlined_call_operand.vmem [shape: f32[2,1,256], index: 5, kind: input, shape index: {}]   ;;  %s1236_s6 = inlined_call_operand.vmem [shape: f32[2,1,256], index: 6, kind: output, shape index: {0}]   ;;  %s1237_s7 = inlined_call_operand.vmem [shape: f32[2,5,1], index: 7, kind: output, shape index: {1}]  }
   0x1   :  { %s1091_s26 = smov 0  }
   0x2 LB: > { %s30_s27 = sadd.s32 1, %s1038_s25  ;;  %p954_p0 = scmp.ge.s32.totalorder %s1042_s26, 1  ;;  %s1042_s26 = sphi %s1091_s26, %s18_s26   ;;  %s1038_s25 = sphi %s1089_s25, %s1241_s25   ;;  %s1034_s24 = sphi %s1087_s24, %s1240_s24  }
   0x3   : > { %p32_p1 = scmp.ge.s32.totalorder %s30_s27, 2  ;;  %p343_p2 = scmp.lt.s32.totalorder %s1042_s26, 3 }
   0x5   : > { %s1243_s27 = smov (%p32_p1, %s30_s27), 0  ;;  %p344_p3 = pnand %p954_p0, %p343_p2 }
   0x6   : > { %p429_p4 = scmp.lt.s32.totalorder (!%p344_p3), %s1034_s24, 1 }
   0x7   : > { %347 = sbr.rel (%p344_p3) target bundleno = 207 (0xcf), region = 44 }
   0xc   : > { %s1245_s24 = smov (!%p429_p4, %s1034_s24), 1  ;;  %vm502_vm0 = vcmask 4096   ;;  %v568_v6 = vlaneseq  ;;  %v1044_v10 = vmov 0.0   ;;  %vm606_vm3 = vcmask 1042432  }
   0xd   : > { %s968_s28 = sshll.u32 %s1245_s24, 4  ;;  %s1105_s29 = sshll.u32 %s1245_s24, 1  ;;  %v1045_v31 = vmov 2.0   ;;  %vm524_vm4 = vcmask 1040384   ;;  %vm739_vm15 = vcmask 1041408  }
   0xe   : > { %s436_s9 = scalar_lea.vmem %s1230_s0, %s968_s28  ;;  %s445_s12 = scalar_lea.vmem %s1231_s1, %s1105_s29  ;;  %v569_v14 = vshrl.u32 %v568_v6, 7  ;;  %998 = vrcp.f32 %v1045_v31 }
   0xf   : > { %s969_s13 = sshll.u32 %s1245_s24, 3  ;;  %v504_v0 = vld [vmem:[%s436_s9] sm:$0xff]  ;;  %v505_v1 = vld [vmem:[%s436_s9 + $0x8] sm:$0xff]  ;;  %s483_s28 = scalar_lea.vmem %s1235_s5, %s1105_s29 }
  0x10   : > { %s464_s16 = scalar_lea.vmem %s1233_s3, %s969_s13  ;;  %s474_s19 = scalar_lea.vmem %s1234_s4, %s969_s13  ;;  %v532_v2 = vrot.slane %v504_v0, 4  ;;  %v538_v3 = vrot.slane %v505_v1, 4  ;;  %v1125_v7 = vld [vmem:[%s445_s12] sm:$0x3] }
  0x11   : > { %v508_v4 = vld [vmem:[%s464_s16] sm:$0x77]  ;;  %s1123_s22 = scalar_lea.vmem %s1237_s7, %s969_s13  ;;  %v571_v15 = vperm.slane %v1125_v7, 1  ;;  %v570_v19 = vperm.slane %v1125_v7, 0  ;;  %vm520_vm6 = vcmp.ne.s32.totalorder %v1125_v7, 0  ;;  %s454_s9 = scalar_lea.vmem %s1232_s2, %s1105_s29 }
  0x12   : > { %v509_v5 = vld [vmem:[%s474_s19] sm:$0x77]  ;;  %v533_v8 = vmax.f32 %v504_v0, %v532_v2  ;;  %v539_v9 = vmax.f32 %v505_v1, %v538_v3  ;;  %503 = vst.msk [vmem:[%s1123_s22] sm:$0x1f] %vm502_vm0, %v1044_v10  ;;  %s492_s12 = scalar_lea.vmem %s1236_s6, %s1105_s29 }
  0x13   : > { %v598_v11 = vsub.f32 %v508_v4, %v509_v5  ;;  %vm573_vm1 = vcmp.eq.s32.totalorder %v569_v14, %v571_v15  ;;  %vm572_vm2 = vcmp.eq.s32.totalorder %v569_v14, %v570_v19  ;;  %v651_v27 = vmul.f32 %v509_v5, %v509_v5 }
  0x14   : > { %v534_v12 = vrot.slane %v533_v8, 2  ;;  %v540_v13 = vrot.slane %v539_v9, 2  ;;  %v575_v26 = vsel %vm573_vm1, 1.0, %v1044_v10  ;;  %v574_v28 = vsel %vm572_vm2, 1.0, %v1044_v10  ;;  %v1143_v42 = vpop.eup %998 }
  0x15   : > { %v599_v16 = vmul.f32 %v598_v11, %v598_v11  ;;  %v577_v32 = vmul.f32 %v575_v26, %v505_v1  ;;  %v576_v35 = vmul.f32 %v574_v28, %v504_v0  ;;  %v675_v53 = vmul.f32 2.0, %v1143_v42 }
  0x16   : > { %v535_v17 = vmax.f32 %v533_v8, %v534_v12  ;;  %v541_v18 = vmax.f32 %v539_v9, %v540_v13  ;;  %vm679_vm5 = vweird.f32 %v1143_v42  ;;  %vm708_vm1 = vcmp.lt.s32.totalorder %v568_v6, 256 }
  0x17   : > { %601 = vst [vmem:[#allocation1] ss:$2 sm:$0xff] %v599_v16  ;;  %v578_v43 = vrot.slane %v576_v35, 4  ;;  %v584_v44 = vrot.slane %v577_v32, 4  ;;  %v676_v9 = vsub.f32 1.0, %v675_v53  ;;  %vm744_vm2 = vcmask 1043456  }
  0x18   : > { %v536_v20 = vrot.slane %v535_v17, 1  ;;  %v542_v21 = vrot.slane %v541_v18, 1 }
  0x19   : > { %v579_v55 = vadd.f32 %v578_v43, %v576_v35  ;;  %v585_v56 = vadd.f32 %v584_v44, %v577_v32 }
  0x1a   : > { %v1133_v22 = vmax.f32 %v535_v17, %v536_v20  ;;  %v1135_v23 = vmax.f32 %v541_v18, %v542_v21  ;;  %v510_v17 = vld [vmem:[%s483_s28] sm:$0x3]  ;;  %v677_v20 = vmul.f32 %v1143_v42, %v676_v9 }
  0x1b   : > { %v580_v12 = vrot.slane %v579_v55, 2  ;;  %v586_v13 = vrot.slane %v585_v56, 2 }
  0x1c   : > { %v544_v24 = vsub.f32 %v504_v0, %v1133_v22  ;;  %v545_v25 = vsub.f32 %v505_v1, %v1135_v23 }
  0x1e   : > { %v546_v29 = vmul.f32 1.442695, %v544_v24  ;;  %v548_v30 = vmul.f32 1.442695, %v545_v25  ;;  %v581_v24 = vadd.f32 %v580_v12, %v579_v55  ;;  %v587_v25 = vadd.f32 %v586_v13, %v585_v56 }
  0x1f   : > { %v602_v33 = vld.sshfl [vmem:[#allocation1] sm:$0xff pattern:$0x75316420]  ;;  %v603_v34 = vld.sshfl [vmem:[#allocation1 + $0x8] sm:$0xff pattern:$0x75316420] }
  0x20   : > { %1000 = vpow2.f32 %v546_v29  ;;  %v607_v36 = vsel %vm606_vm3, %v602_v33, 0.0  ;;  %v614_v37 = vsel %vm606_vm3, %v603_v34, 0.0  ;;  %653 = vst [vmem:[#allocation1] ss:$2 sm:$0xff] %v651_v27  ;;  %v1046_v27 = vmov 1  }
  0x21   : > { %1002 = vpow2.f32 %v548_v30  ;;  %v608_v38 = vrot.slane %v607_v36, 4  ;;  %v615_v39 = vrot.slane %v614_v37, 4  ;;  %v523_v28 = vrot.slane %v1046_v27, 7 }
  0x22   : > { %v698_v33 = vsub.f32 1.0, %v510_v17 }
  0x23   : > { %v609_v40 = vadd.f32 %v608_v38, %v607_v36  ;;  %v616_v41 = vadd.f32 %v615_v39, %v614_v37  ;;  %v678_v37 = vadd.f32 %v1143_v42, %v677_v20  ;;  %v582_v38 = vrot.slane %v581_v24, 1 }
  0x24   : > { %v588_v39 = vrot.slane %v587_v25, 1 }
  0x25   : > { %v610_v45 = vrot.slane %v609_v40, 2  ;;  %v617_v46 = vrot.slane %v616_v41, 2 }
  0x26   : > { %v1001_v47 = vpop.eup %1000  ;;  %v589_v55 = vadd.f32 %v588_v39, %v587_v25 }
  0x27   : > { %v1003_v48 = vpop.eup %1002  ;;  %v550_v49 = vrot.slane %v1001_v47, 4  ;;  %v611_v50 = vadd.f32 %v610_v45, %v609_v40  ;;  %v618_v51 = vadd.f32 %v617_v46, %v616_v41  ;;  %v654_v52 = vld.sshfl [vmem:[#allocation1] sm:$0xff pattern:$0x75316420]  ;;  %v693_v45 = vadd.f32 1e-12, %v510_v17 }
  0x28   : > { %v556_v54 = vrot.slane %v1003_v48, 4  ;;  %v655_v57 = vld.sshfl [vmem:[#allocation1 + $0x8] sm:$0xff pattern:$0x75316420]  ;;  %v658_v58 = vsel %vm606_vm3, %v654_v52, 0.0  ;;  %v525_v46 = vsel %vm524_vm4, 1, %v523_v28  ;;  %v680_v52 = vsel %vm679_vm5, %v1143_v42, %v678_v37 }
  0x29   : > { %v551_v59 = vadd.f32 %v1001_v47, %v550_v49  ;;  %v612_v60 = vrot.slane %v611_v50, 1  ;;  %v619_v61 = vrot.slane %v618_v51, 1  ;;  %v659_v62 = vrot.slane %v658_v58, 4 }
  0x2a   : > { %v557_v63 = vadd.f32 %v1003_v48, %v556_v54  ;;  %v665_v0 = vsel %vm606_vm3, %v655_v57, 0.0  ;;  %v699_v49 = vadd.f32 1e-12, %v698_v33  ;;  %v583_v54 = vadd.f32 %v582_v38, %v581_v24 }
  0x2b   : > { %v552_v1 = vrot.slane %v551_v59, 2  ;;  %v1148_v2 = vadd.f32 %v612_v60, %v611_v50  ;;  %v1150_v3 = vadd.f32 %v619_v61, %v618_v51  ;;  %v660_v4 = vadd.f32 %v659_v62, %v658_v58 }
  0x2c   : > { %v558_v5 = vrot.slane %v557_v63, 2  ;;  %v666_v8 = vrot.slane %v665_v0, 4  ;;  %vm526_vm11 = vcmp.ne.s32.totalorder %v525_v46, 0 }
  0x2d   : > { %v553_v11 = vadd.f32 %v552_v1, %v551_v59  ;;  %1004 = vrsqrt.f32 %v1148_v2  ;;  %v661_v16 = vrot.slane %v660_v4, 2  ;;  %vm628_vm7 = vcmp.eq.f32.partialorder %v1148_v2, inf  ;;  %vm1190_vm12 = vmand %vm520_vm6, %vm526_vm11 }
  0x2e   : > { %v559_v14 = vadd.f32 %v558_v5, %v557_v63  ;;  %1006 = vrsqrt.f32 %v1150_v3  ;;  %v667_v19 = vadd.f32 %v666_v8, %v665_v0  ;;  %v631_v8 = vand.u32 2147483648, %v1148_v2 }
  0x2f   : > { %v554_v15 = vrot.slane %v553_v11, 1  ;;  %v662_v26 = vadd.f32 %v661_v16, %v660_v4  ;;  %vm640_vm8 = vcmp.eq.f32.partialorder %v1150_v3, inf  ;;  %vm642_vm9 = vcmp.eq.f32.partialorder %v1150_v3, 0.0 }
  0x30   : > { %v560_v18 = vrot.slane %v559_v14, 1  ;;  %v668_v30 = vrot.slane %v667_v19, 2  ;;  %vm630_vm10 = vcmp.eq.f32.partialorder %v1148_v2, 0.0  ;;  %v530_v28 = vsel %vm1190_vm12, 1.0, %v1044_v10 }
  0x31   : > { %v555_v21 = vadd.f32 %v554_v15, %v553_v11  ;;  %v663_v32 = vrot.slane %v662_v26, 1  ;;  %v718_v33 = vperm.slane %v530_v28, 0 }
  0x32   : > { %v561_v29 = vadd.f32 %v560_v18, %v559_v14  ;;  %v669_v36 = vadd.f32 %v668_v30, %v667_v19  ;;  %v507_v18 = vld [vmem:[%s454_s9] sm:$0x3] }
  0x33   : > { %v1005_v31 = vpop.eup %1004  ;;  %1008 = vlog2.f32 %v555_v21  ;;  %v664_v41 = vadd.f32 %v663_v32, %v662_v26  ;;  %vm528_vm13 = vcmp.ge.s32.totalorder %v507_v18, 0 }
  0x34   : > { %v1007_v34 = vpop.eup %1006  ;;  %1010 = vlog2.f32 %v561_v29  ;;  %v622_v35 = vmul.f32 %v1005_v31, %v1148_v2  ;;  %v670_v44 = vrot.slane %v669_v36, 1  ;;  %vm529_vm14 = vmand %vm528_vm13, %vm526_vm11 }
  0x35   : > { %v634_v40 = vmul.f32 %v1007_v34, %v1150_v3  ;;  %v672_v48 = vsub.f32 0.0, %v664_v41  ;;  %1012 = vlog2.f32 %v693_v45 }
  0x36   : > { %v623_v43 = vmul.f32 %v1005_v31, %v622_v35  ;;  %v671_v51 = vadd.f32 %v670_v44, %v669_v36  ;;  %1014 = vlog2.f32 %v699_v49 }
  0x37   : > { %v635_v47 = vmul.f32 %v1007_v34, %v634_v40  ;;  %v681_v57 = vmul.f32 %v680_v52, %v672_v48 }
  0x38   : > { %v624_v50 = vmul.f32 0.5, %v623_v43  ;;  %v673_v61 = vsub.f32 0.0, %v671_v51  ;;  %v531_v43 = vsel %vm529_vm14, 1.0, %v1044_v10 }
  0x39   : > { %v1009_v53 = vpop.eup %1008  ;;  %v636_v56 = vmul.f32 0.5, %v635_v47  ;;  %v683_v0 = vmul.f32 1.442695, %v681_v57  ;;  %v729_v51 = vperm.slane %v531_v43, 1 }
  0x3a   : > { %v1011_v58 = vpop.eup %1010  ;;  %v563_v59 = vmul.f32 0.6931472, %v1009_v53  ;;  %v625_v60 = vsub.f32 1.5, %v624_v50  ;;  %v682_v42 = vmul.f32 %v680_v52, %v673_v61  ;;  %v728_v50 = vperm.slane %v531_v43, 0 }
  0x3b   : > { %v565_v62 = vmul.f32 0.6931472, %v1011_v58  ;;  %v637_v63 = vsub.f32 1.5, %v636_v56  ;;  %1016 = vpow2.f32 %v683_v0  ;;  %v1013_v15 = vpop.eup %1012  ;;  %v747_v0 = vld [vmem:[%s1123_s22] sm:$0x1f] }
  0x3c   : > { %v566_v1 = vadd.f32 %v563_v59, %v1133_v22  ;;  %v626_v4 = vmul.f32 %v1005_v31, %v625_v60  ;;  %v643_v22 = vand.u32 2147483648, %v1150_v3  ;;  %v685_v12 = vmul.f32 1.442695, %v682_v42  ;;  %v1015_v17 = vpop.eup %1014 }
  0x3d   : > { %v567_v5 = vadd.f32 %v565_v62, %v1135_v23  ;;  %v638_v9 = vmul.f32 %v1007_v34, %v637_v63  ;;  %v701_v32 = vmul.f32 0.6931472, %v1015_v17  ;;  %v719_v34 = vperm.slane %v530_v28, 1 }
  0x3e   : > { %v627_v11 = vmul.f32 %v626_v4, %v1148_v2  ;;  %v590_v13 = vsub.f32 %v566_v1, %v583_v54  ;;  %1018 = vpow2.f32 %v685_v12 }
  0x3f   : > { %v591_v14 = vsub.f32 %v567_v5, %v589_v55  ;;  %v639_v23 = vmul.f32 %v638_v9, %v1150_v3 }
  0x40   : > { %v629_v16 = vsel %vm628_vm7, %v1148_v2, %v627_v11 }
  0x41   : > { %v594_v19 = vrot.slane %v591_v14, 7  ;;  %v641_v20 = vsel %vm640_vm8, %v1150_v3, %v639_v23  ;;  %v632_v25 = vsel %vm630_vm10, %v631_v8, %v629_v16  ;;  %v1017_v27 = vpop.eup %1016  ;;  %v695_v3 = vmul.f32 0.6931472, %v1013_v15 }
  0x42   : > { %v644_v24 = vsel %vm642_vm9, %v643_v22, %v641_v20 }
  0x43   : > { %v595_v2 = vsel %vm524_vm4, %v590_v13, %v594_v19  ;;  %v647_v26 = vrot.slane %v644_v24, 7 }
  0x44   : > { %v1019_v29 = vpop.eup %1018  ;;  %v597_v7 = vsel %vm1190_vm12, %v595_v2, 0.0 }
  0x45   : > { %v648_v30 = vsel %vm524_vm4, %v632_v25, %v647_v26  ;;  %v689_v31 = vrot.slane %v1019_v29, 7  ;;  %v713_v37 = vperm.slane %v597_v7, 0  ;;  %v714_v38 = vperm.slane %v597_v7, 1 }
  0x46   : > { %v650_v35 = vsel %vm529_vm14, %v648_v30, 0.0 }
  0x47   : > { %v690_v36 = vsel %vm524_vm4, %v1017_v27, %v689_v31  ;;  %v723_v44 = vperm.slane %v650_v35, 0  ;;  %v724_v45 = vperm.slane %v650_v35, 1  ;;  %v737_v47 = vsel %vm524_vm4, %v713_v37, %v718_v33 }
  0x48   : > { %v692_v39 = vsel %vm529_vm14, %v690_v36, 0.0  ;;  %v738_v48 = vsel %vm524_vm4, %v714_v38, %v719_v34  ;;  %vm748_vm4 = vcmask 1044480  }
  0x49   : > { %v696_v40 = vmul.f32 %v695_v3, %v692_v39  ;;  %v697_v41 = vsub.f32 1.0, %v692_v39  ;;  %v740_v52 = vsel %vm739_vm15, %v737_v47, %v723_v44  ;;  %v741_v53 = vsel %vm739_vm15, %v738_v48, %v724_v45 }
  0x4a   : > { %v742_v56 = vsel %vm606_vm3, %v740_v52, %v728_v50  ;;  %v743_v57 = vsel %vm606_vm3, %v741_v53, %v729_v51 }
  0x4b   : > { %v702_v46 = vmul.f32 %v701_v32, %v697_v41 }
  0x4d   : > { %v703_v49 = vadd.f32 %v702_v46, %v696_v40 }
  0x4f   : > { %v704_v54 = vsub.f32 0.0, %v703_v49 }
  0x51   : > { %v705_v10 = vsel %vm1190_vm12, %v704_v54, -1e+30  ;;  %v711_v55 = vsel %vm1190_vm12, %v704_v54, 0.0 }
  0x52   : > { %710 = vst.msk [vmem:[%s492_s12] sm:$0x3] %vm708_vm1, %v705_v10  ;;  %v733_v58 = vperm.slane %v711_v55, 0  ;;  %v734_v59 = vperm.slane %v711_v55, 1 }
  0x54   : > { %v745_v60 = vsel %vm744_vm2, %v742_v56, %v733_v58  ;;  %v746_v61 = vsel %vm744_vm2, %v743_v57, %v734_v59 }
  0x55   : > { %v749_v6 = vsel %vm748_vm4, %v745_v60, 0.0  ;;  %v750_v62 = vsel %vm748_vm4, %v746_v61, 0.0 }
  0x56   : > { %v751_v63 = vadd.f32 %v750_v62, %v749_v6 }
  0x58   : > { %752 = vadd.xlane.f32.xlu0 %v751_v63 }
  0xcb   : > { %v753_v1 = vpop.xlane.xlu0 %752 }
  0xcc   : > { %v754_v4 = vadd.f32 %v753_v1, %v747_v0 }
  0xce   : > { %756 = vst.msk [vmem:[%s1123_s22] sm:$0x1f] %vm502_vm0, %v754_v4 }
  0xcf PF: > { %s18_s26 = sadd.s32 1, %s1042_s26   ;;  %s1240_s24 = smov %s1038_s25 }
  0xd0   : > { %p15_p5 = scmp.ge.s32.totalorder %s18_s26, 4   ;;  %s1241_s25 = smov %s1243_s27 }
  0xd2   :  { %17 = sbr.rel (!%p15_p5) target bundleno = 2 (0x2), region = 105 }

</bundles_post_ra>
